<compile_context>
chip_gen: v7x
topology: tpu7x:2x2x1
jax: 0.10.0
libtpu: 0.0.40
codegen_flags: <defaults>
</compile_context>

<pallas_src>
import functools

import numpy as np
import jax
import jax.numpy as jnp
from jax.experimental import pallas as pl
from jax.experimental.pallas import tpu as pltpu

# branch indices
PHI, PSI, U_IDX, P_IDX = 0, 1, 2, 3


def _pads(kernel_size, dilation=1):
    if kernel_size % 2 == 0:
        pad_l = dilation * (kernel_size - 2) // 2 + 1
        pad_r = dilation * kernel_size // 2 + 1
    else:
        pad_l = dilation * (kernel_size - 1) // 2 + 1
        pad_r = dilation * (kernel_size - 1) // 2 + 1
    return pad_l, pad_r


def _round_up(x, m):
    return (x + m - 1) // m * m


def _interactor_kernel(xeo_ref, delta_ref, w1_ref, b1_ref, w2_ref, b2_ref,
                       out_ref, rhs_ref,
                       *, C, H, K1, K2, pad_l, pad_r, mxu_dtype):
    """One batch block per grid step.

    xeo_ref : (2C, W) f32   rows [x_even ; x_odd], replication-padded, batch
                            folded into lanes with per-series stride S
    delta_ref: (1, W) int32 per-lane replication-pad shift table
    w1_ref  : (2, 2H, K1*2C)  fused first-conv weights  (stage 0: phi|psi,
    w2_ref  : (2, 2C, K2*2H)   stage 1: U|P), block-diagonal per pair
    b1_ref  : (2, 2H, 1) f32 ; b2_ref : (2, 2C, 1) f32
    out_ref : (2C, W) f32   rows [x_even_update ; x_odd_update]
    rhs_ref : (K1*2C, W)    VMEM im2col stack for the first conv (fully
                            overwritten every call -> never zeroed)
    """
    W = out_ref.shape[-1]
    R = 2 * C
    RH = 2 * H

    def lshift(v, k):
        # circular shift: result[:, j] = v[:, j + k]; wrapped tail lanes only
        # feed outputs that the wrapper discards (see invariant above).
        return pltpu.roll(v, (W - k) % W, axis=1) if k else v

    def conv1(y, stage):
        # first Conv1d (kernel K1): ONE fused block-diagonal im2col matmul.
        # The K1 shifted copies are written as full-width, lane-aligned rows.
        yc = y.astype(mxu_dtype)
        for k in range(K1):
            rhs_ref[k * R:(k + 1) * R, :] = lshift(yc, k)
        h = jnp.dot(w1_ref[stage], rhs_ref[...],
                    preferred_element_type=jnp.float32) + b1_ref[stage]
        # TODO(synk): Dropout (module default p=0 / eval mode) is identity.
        return jnp.where(h > 0, h, 0.01 * h)          # LeakyReLU(0.01)

    def conv2(h, stage):
        # second Conv1d (kernel K2=3): per-tap matmuls on the SAME unshifted
        # activation; the small (2C)-row results are rolled and accumulated
        # instead of materializing a K2*2H-row im2col stack.
        hc = h.astype(mxu_dtype)                       # leaky fused w/ cast
        w2 = w2_ref[stage]                             # (2C, K2*2H)
        acc = jnp.dot(w2[:, :RH], hc, preferred_element_type=jnp.float32)
        for k in range(1, K2):
            g = jnp.dot(w2[:, k * RH:(k + 1) * RH], hc,
                        preferred_element_type=jnp.float32)
            acc = acc + lshift(g, k)
        return jnp.tanh(acc + b2_ref[stage])

    # ---- stage 1: phi(x_even) | psi(x_odd), block-diagonally fused ----
    x1 = xeo_ref[...]                                  # (2C, W) padded frame
    s1 = conv2(conv1(x1, 0), 0)                        # rows [phi(xe); psi(xo)]

    # aligned multiplier [x_odd ; x_even] derived in-kernel from xeo
    # (half-row swap + pad_l lane roll) -- no separate xoe HBM stream.
    xsw = jnp.concatenate([x1[C:, :], x1[:C, :]], axis=0)
    dc = lshift(xsw, pad_l) * jnp.exp(s1)              # rows [d ; c]

    # ReplicationPad1d((pad_l, pad_r)) of (d, c) per batch segment: select
    # among right-rolled copies keyed by the constant per-lane shift `delta`.
    delta = delta_ref[...]                             # (1, W) int32
    dcpad = dc
    for sh in range(1, pad_l + pad_r + 1):
        dcpad = jnp.where(delta == sh, pltpu.roll(dc, sh, axis=1), dcpad)

    # ---- stage 2: U(d) | P(c), block-diagonally fused ----
    s2 = conv2(conv1(dcpad, 1), 1)                     # rows [U(d) ; P(c)]

    # x_even_update = c + U(d) ; x_odd_update = d - P(c) : one full 2C store
    out_ref[...] = jnp.concatenate([dc[C:, :] + s2[:C, :],
                                    dc[:C, :] - s2[C:, :]], axis=0)


def init_params(key, in_planes, kernel_size, hidden_size=1):
    """Synthetic parameters for the 4 branches (phi, psi, U, P)."""
    H = int(in_planes * hidden_size)
    K1, K2 = kernel_size, 3
    keys = jax.random.split(key, 16)
    W1s, b1s, W2s, b2s = [], [], [], []
    for i in range(4):
        W1s.append(jax.random.normal(keys[4 * i + 0], (H, in_planes, K1), jnp.float32) * 0.2)
        b1s.append(jax.random.normal(keys[4 * i + 1], (H,), jnp.float32) * 0.1)
        W2s.append(jax.random.normal(keys[4 * i + 2], (in_planes, H, K2), jnp.float32) * 0.2)
        b2s.append(jax.random.normal(keys[4 * i + 3], (in_planes,), jnp.float32) * 0.1)
    return dict(W1=jnp.stack(W1s),   # (4, H, C, K1)
                b1=jnp.stack(b1s),   # (4, H)
                W2=jnp.stack(W2s),   # (4, C, H, K2)
                b2=jnp.stack(b2s))   # (4, C)


def level_scinet_forward(x, params, kernel_size=5, *, use_bf16=True,
                         lane_target=8192):
    """x: (B, T, C) -> (even_update, odd_update), each (B, T//2, C)."""
    x = x.astype(jnp.float32)
    B, T, C = x.shape
    assert T % 2 == 0, "even sequence length required"
    L = T // 2
    pad_l, pad_r = _pads(kernel_size)
    K1, K2 = kernel_size, 3
    S = L + pad_l + pad_r                       # padded per-series length
    H = params["W1"].shape[1]
    mxu_dtype = jnp.bfloat16 if use_bf16 else jnp.float32
    itemb = 2 if use_bf16 else 4

    # ---- VMEM-aware lane-tile / batch-block selection ----
    per_lane = 4 * (2 * C * 4)                  # xeo + out, double-buffered
    per_lane += 2 * 4                           # delta, double-buffered int32
    per_lane += K1 * 2 * C * itemb              # conv-1 im2col scratch
    per_lane += 2 * (2 * H) * (4 + itemb)       # conv-1 result f32 + cast copy
    per_lane += 24 * 2 * C * 4                  # assorted (2C, W) f32 temps
    try:
        vmem_cap = int(pltpu.get_tpu_info().vmem_capacity_bytes)
    except Exception:                           # fall back: v5e/v6e capacity
        vmem_cap = 128 * 1024 * 1024
    lane_cap = max(128, (int(0.45 * vmem_cap) // per_lane) // 128 * 128)
    lane_budget = min(lane_target, lane_cap)

    Bblk = max(1, min(B, lane_budget // S))
    if B >= 2:
        # keep >= 2 grid steps: both v7x TensorCores get work and the
        # BlockSpec pipeline has something to overlap.
        Bblk = min(Bblk, -(-B // 2))
    G = -(-B // Bblk)                           # number of grid steps
    Bp = G * Bblk
    Wv = Bblk * S                               # valid lanes per block
    Wblk = max(128, _round_up(Wv, 128))         # lane-dense (unmasked stores)
    vmem_limit = int(min(0.7 * vmem_cap,
                         max(32 << 20, 1.5 * per_lane * Wblk + (4 << 20))))

    # ---- single-stream prologue: even/odd split -> channel-major -> edge pad
    xeo = jnp.transpose(x.reshape(B, L, 2, C), (0, 2, 3, 1)).reshape(B, 2 * C, L)
    xeo = jnp.pad(xeo, ((0, 0), (0, 0), (pad_l, pad_r)), mode="edge")   # (B,2C,S)
    if Bp != B:
        xeo = jnp.concatenate(
            [xeo, jnp.zeros((Bp - B, 2 * C, S), xeo.dtype)], axis=0)
    xeo = jnp.transpose(xeo.reshape(G, Bblk, 2 * C, S), (0, 2, 1, 3))
    xeo = xeo.reshape(G, 2 * C, Wv)
    if Wblk != Wv:
        xeo = jnp.pad(xeo, ((0, 0), (0, 0), (0, Wblk - Wv)))

    # constant per-lane replication-pad shift distance (same for every block)
    u = np.arange(Wblk) % S
    delta_np = np.where(u < pad_l, u,
                        np.where(u < pad_l + L, pad_l, u - (L - 1)))
    delta = jnp.asarray(delta_np.astype(np.int32))[None, :]            # (1,Wblk)

    # ---- fused flat 2-D weight slabs (block-diagonal branch pairs) ----
    W1, W2 = params["W1"], params["W2"]
    b1, b2 = params["b1"], params["b2"]

    def fuse1(i, j):                 # first conv, (2H, K1*2C)
        w = jnp.zeros((2 * H, K1, 2 * C), jnp.float32)
        w = w.at[:H, :, :C].set(jnp.transpose(W1[i], (0, 2, 1)))
        w = w.at[H:, :, C:].set(jnp.transpose(W1[j], (0, 2, 1)))
        return w.reshape(2 * H, K1 * 2 * C)

    def fuse2(i, j):                 # second conv, (2C, K2*2H)
        w = jnp.zeros((2 * C, K2, 2 * H), jnp.float32)
        w = w.at[:C, :, :H].set(jnp.transpose(W2[i], (0, 2, 1)))
        w = w.at[C:, :, H:].set(jnp.transpose(W2[j], (0, 2, 1)))
        return w.reshape(2 * C, K2 * 2 * H)

    w1s = jnp.stack([fuse1(PHI, PSI), fuse1(U_IDX, P_IDX)]).astype(mxu_dtype)
    w2s = jnp.stack([fuse2(PHI, PSI), fuse2(U_IDX, P_IDX)]).astype(mxu_dtype)
    b1s = jnp.stack([jnp.concatenate([b1[PHI], b1[PSI]]),
                     jnp.concatenate([b1[U_IDX], b1[P_IDX]])])[:, :, None]
    b2s = jnp.stack([jnp.concatenate([b2[PHI], b2[PSI]]),
                     jnp.concatenate([b2[U_IDX], b2[P_IDX]])])[:, :, None]

    kern = functools.partial(_interactor_kernel, C=C, H=H, K1=K1, K2=K2,
                             pad_l=pad_l, pad_r=pad_r, mxu_dtype=mxu_dtype)

    out = pl.pallas_call(
        kern,
        out_shape=jax.ShapeDtypeStruct((G, 2 * C, Wblk), jnp.float32),
        grid=(G,),
        in_specs=[
            pl.BlockSpec((None, 2 * C, Wblk), lambda g: (g, 0, 0)),   # xeo
            pl.BlockSpec((1, Wblk), lambda g: (0, 0)),                # delta
            # constant index maps -> weights/biases are not re-DMA'd per step
            pl.BlockSpec((2, 2 * H, K1 * 2 * C), lambda g: (0, 0, 0)),
            pl.BlockSpec((2, 2 * H, 1), lambda g: (0, 0, 0)),
            pl.BlockSpec((2, 2 * C, K2 * 2 * H), lambda g: (0, 0, 0)),
            pl.BlockSpec((2, 2 * C, 1), lambda g: (0, 0, 0)),
        ],
        out_specs=pl.BlockSpec((None, 2 * C, Wblk), lambda g: (g, 0, 0)),
        scratch_shapes=[pltpu.VMEM((K1 * 2 * C, Wblk), mxu_dtype)],
        compiler_params=pltpu.CompilerParams(
            dimension_semantics=("parallel",),        # megacore on v7x
            vmem_limit_bytes=vmem_limit),
    )(xeo, delta, w1s, b1s, w2s, b2s)

    # TODO(synk): when stacking SCINet levels, emit the next level's layout
    # directly from the kernel and skip this reshape/transpose epilogue.
    out = out[:, :, :Wv].reshape(G, 2 * C, Bblk, S)[..., :L]
    out = jnp.transpose(out, (0, 2, 3, 1)).reshape(Bp, L, 2 * C)[:B]   # (B,L,2C)
    return out[..., :C], out[..., C:]


def scinet_forward(x, params, kernel_size=5, **kw):
    """SCINet forward (num_stacks=1, num_levels=1, the module defaults):
    EncoderTree -> single LevelSCINet -> zip_up_the_pants interleave."""
    assert x.shape[1] % 2 == 0
    # TODO(synk): num_levels > 1 would recurse on the even/odd halves with
    # per-node parameters, reusing this same kernel per tree node.
    even_up, odd_up = level_scinet_forward(x, params, kernel_size, **kw)
    B, L, C = even_up.shape
    return jnp.stack([even_up, odd_up], axis=2).reshape(B, 2 * L, C)


# ---------------- pure-JAX reference (correctness check) ----------------
def _ref_branch(x_ncl, W1, b1, W2, b2, pad_l, pad_r):
    xpad = jnp.pad(x_ncl, ((0, 0), (0, 0), (pad_l, pad_r)), mode="edge")
    h = jax.lax.conv_general_dilated(xpad, W1, (1,), "VALID",
                                     dimension_numbers=("NCH", "OIH", "NCH"))
    h = h + b1[None, :, None]
    h = jnp.where(h > 0, h, 0.01 * h)
    y = jax.lax.conv_general_dilated(h, W2, (1,), "VALID",
                                     dimension_numbers=("NCH", "OIH", "NCH"))
    y = y + b2[None, :, None]
    return jnp.tanh(y)


def scinet_reference(x, params, kernel_size=5):
    x = x.astype(jnp.float32)
    pad_l, pad_r = _pads(kernel_size)
    xe = jnp.transpose(x[:, ::2, :], (0, 2, 1))
    xo = jnp.transpose(x[:, 1::2, :], (0, 2, 1))

    def br(i, z):
        return _ref_branch(z, params["W1"][i], params["b1"][i],
                           params["W2"][i], params["b2"][i], pad_l, pad_r)

    d = xo * jnp.exp(br(PHI, xe))
    c = xe * jnp.exp(br(PSI, xo))
    even_up = jnp.transpose(c + br(U_IDX, d), (0, 2, 1))
    odd_up = jnp.transpose(d - br(P_IDX, c), (0, 2, 1))
    B, L, C = even_up.shape
    return jnp.stack([even_up, odd_up], axis=2).reshape(B, 2 * L, C)


if __name__ == "__main__":
    key = jax.random.PRNGKey(0)
    k_x, k_p = jax.random.split(key)

    B, T, C = 2, 16, 4            # batch, sequence length, channels
    kernel_size, hidden_size = 5, 8

    x = jax.random.normal(k_x, (B, T, C), jnp.float32)
    params = init_params(k_p, C, kernel_size, hidden_size)

    ref = scinet_reference(x, params, kernel_size)

    # f32 MXU path: tight correctness check
    out_f32 = scinet_forward(x, params, kernel_size, use_bf16=False)
    jax.block_until_ready(out_f32)
    assert out_f32.shape == (B, T, C)
    assert jnp.allclose(out_f32, ref, atol=1e-3, rtol=1e-3)

    # bf16 MXU operands (production path), f32 accumulation: loose check
    out_bf16 = scinet_forward(x, params, kernel_size, use_bf16=True)
    jax.block_until_ready(out_bf16)
    assert out_bf16.shape == (B, T, C)
    assert jnp.max(jnp.abs(out_bf16 - ref)) < 0.15

    print("KERNEL_OK")
</pallas_src>

<mosaic_0001>
module attributes {stable_mosaic.version = 11 : i64} {
  func.func @_interactor_kernel(%arg0: i32, %arg1: memref<1x8x128xf32, #tpu.memory_space<vmem>>, %arg2: memref<1x128xi32, #tpu.memory_space<vmem>>, %arg3: memref<2x64x40xf32, #tpu.memory_space<vmem>>, %arg4: memref<2x64x1xf32, #tpu.memory_space<vmem>>, %arg5: memref<2x8x192xf32, #tpu.memory_space<vmem>>, %arg6: memref<2x8x1xf32, #tpu.memory_space<vmem>>, %arg7: memref<1x8x128xf32, #tpu.memory_space<vmem>>, %arg8: memref<40x128xf32, #tpu.memory_space<vmem>>) attributes {dimension_semantics = [#tpu.dimension_semantics<parallel>], iteration_bounds = array<i64: 2>, scalar_prefetch = 0 : i64, scratch_operands = 1 : i64, tpu.core_type = #tpu.core_type<tc>, window_params = [{transform_indices = @transform_0, window_bounds = array<i64: 1, 8, 128>}, {pipeline_mode = #tpu.pipeline_mode<synchronous>, transform_indices = @transform_1, window_bounds = array<i64: 1, 128>}, {pipeline_mode = #tpu.pipeline_mode<synchronous>, transform_indices = @transform_2, window_bounds = array<i64: 2, 64, 40>}, {pipeline_mode = #tpu.pipeline_mode<synchronous>, transform_indices = @transform_3, window_bounds = array<i64: 2, 64, 1>}, {pipeline_mode = #tpu.pipeline_mode<synchronous>, transform_indices = @transform_4, window_bounds = array<i64: 2, 8, 192>}, {pipeline_mode = #tpu.pipeline_mode<synchronous>, transform_indices = @transform_5, window_bounds = array<i64: 2, 8, 1>}, {transform_indices = @transform_6, window_bounds = array<i64: 1, 8, 128>}]} {
    %c0 = arith.constant 0 : index
    %c0_0 = arith.constant 0 : index
    %c0_1 = arith.constant 0 : index
    %0 = vector.load %arg1[%c0, %c0_0, %c0_1] : memref<1x8x128xf32, #tpu.memory_space<vmem>>, vector<1x8x128xf32>
    %1 = vector.shape_cast %0 : vector<1x8x128xf32> to vector<8x128xf32>
    %c0_2 = arith.constant 0 : index
    %c0_3 = arith.constant 0 : index
    %2 = vector.load %arg8[%c0_2, %c0_3] : memref<40x128xf32, #tpu.memory_space<vmem>>, vector<8x128xf32>
    tpu.vector_store %arg8[%c0_2, %c0_3], %1 {strides = array<i32>} : memref<40x128xf32, #tpu.memory_space<vmem>>, vector<8x128xf32>,
    %c127_i32 = arith.constant 127 : i32
    %3 = tpu.dynamic_rotate %1 by %c127_i32 dim 1 : vector<8x128xf32>, i32 -> vector<8x128xf32>
    %c8 = arith.constant 8 : index
    %c0_4 = arith.constant 0 : index
    %4 = vector.load %arg8[%c8, %c0_4] : memref<40x128xf32, #tpu.memory_space<vmem>>, vector<8x128xf32>
    tpu.vector_store %arg8[%c8, %c0_4], %3 {strides = array<i32>} : memref<40x128xf32, #tpu.memory_space<vmem>>, vector<8x128xf32>,
    %c126_i32 = arith.constant 126 : i32
    %5 = tpu.dynamic_rotate %1 by %c126_i32 dim 1 : vector<8x128xf32>, i32 -> vector<8x128xf32>
    %c16 = arith.constant 16 : index
    %c0_5 = arith.constant 0 : index
    %6 = vector.load %arg8[%c16, %c0_5] : memref<40x128xf32, #tpu.memory_space<vmem>>, vector<8x128xf32>
    tpu.vector_store %arg8[%c16, %c0_5], %5 {strides = array<i32>} : memref<40x128xf32, #tpu.memory_space<vmem>>, vector<8x128xf32>,
    %c125_i32 = arith.constant 125 : i32
    %7 = tpu.dynamic_rotate %1 by %c125_i32 dim 1 : vector<8x128xf32>, i32 -> vector<8x128xf32>
    %c24 = arith.constant 24 : index
    %c0_6 = arith.constant 0 : index
    %8 = vector.load %arg8[%c24, %c0_6] : memref<40x128xf32, #tpu.memory_space<vmem>>, vector<8x128xf32>
    tpu.vector_store %arg8[%c24, %c0_6], %7 {strides = array<i32>} : memref<40x128xf32, #tpu.memory_space<vmem>>, vector<8x128xf32>,
    %c124_i32 = arith.constant 124 : i32
    %9 = tpu.dynamic_rotate %1 by %c124_i32 dim 1 : vector<8x128xf32>, i32 -> vector<8x128xf32>
    %c32 = arith.constant 32 : index
    %c0_7 = arith.constant 0 : index
    %10 = vector.load %arg8[%c32, %c0_7] : memref<40x128xf32, #tpu.memory_space<vmem>>, vector<8x128xf32>
    tpu.vector_store %arg8[%c32, %c0_7], %9 {strides = array<i32>} : memref<40x128xf32, #tpu.memory_space<vmem>>, vector<8x128xf32>,
    %c0_8 = arith.constant 0 : index
    %c0_9 = arith.constant 0 : index
    %c0_10 = arith.constant 0 : index
    %11 = vector.load %arg3[%c0_8, %c0_9, %c0_10] : memref<2x64x40xf32, #tpu.memory_space<vmem>>, vector<1x64x40xf32>
    %12 = vector.shape_cast %11 : vector<1x64x40xf32> to vector<64x40xf32>
    %c0_11 = arith.constant 0 : index
    %c0_12 = arith.constant 0 : index
    %13 = vector.load %arg8[%c0_11, %c0_12] : memref<40x128xf32, #tpu.memory_space<vmem>>, vector<40x128xf32>
    %cst = arith.constant dense<0.000000e+00> : vector<64x128xf32>
    %14 = tpu.matmul %12, %13, %cst {dimension_numbers = #tpu.dot_dimension_numbers<[1], [0], [0], [1], [0, 0, 1, 1], [], []>} : vector<64x40xf32>, vector<40x128xf32>, vector<64x128xf32> -> vector<64x128xf32>
    %c0_13 = arith.constant 0 : index
    %c0_14 = arith.constant 0 : index
    %c0_15 = arith.constant 0 : index
    %15 = vector.load %arg4[%c0_13, %c0_14, %c0_15] : memref<2x64x1xf32, #tpu.memory_space<vmem>>, vector<1x64x1xf32>
    %16 = vector.shape_cast %15 : vector<1x64x1xf32> to vector<64x1xf32>
    %17 = vector.broadcast %16 : vector<64x1xf32> to vector<64x128xf32>
    %18 = arith.addf %14, %17 : vector<64x128xf32>
    %cst_16 = arith.constant 0.000000e+00 : f32
    %19 = vector.broadcast %cst_16 : f32 to vector<64x128xf32>
    %20 = arith.cmpf ogt, %18, %19 : vector<64x128xf32>
    %cst_17 = arith.constant 0.00999999977 : f32
    %21 = vector.broadcast %cst_17 : f32 to vector<64x128xf32>
    %22 = arith.mulf %21, %18 : vector<64x128xf32>
    %23 = arith.select %20, %18, %22 : vector<64x128xi1>, vector<64x128xf32>
    %c0_18 = arith.constant 0 : index
    %c0_19 = arith.constant 0 : index
    %c0_20 = arith.constant 0 : index
    %24 = vector.load %arg5[%c0_18, %c0_19, %c0_20] : memref<2x8x192xf32, #tpu.memory_space<vmem>>, vector<1x8x192xf32>
    %25 = vector.shape_cast %24 : vector<1x8x192xf32> to vector<8x192xf32>
    %26 = vector.extract_strided_slice %25 {offsets = [0, 0], sizes = [8, 64], strides = [1, 1]} : vector<8x192xf32> to vector<8x64xf32>
    %cst_21 = arith.constant dense<0.000000e+00> : vector<8x128xf32>
    %27 = tpu.matmul %26, %23, %cst_21 {dimension_numbers = #tpu.dot_dimension_numbers<[1], [0], [0], [1], [0, 0, 1, 1], [], []>} : vector<8x64xf32>, vector<64x128xf32>, vector<8x128xf32> -> vector<8x128xf32>
    %28 = vector.extract_strided_slice %25 {offsets = [0, 64], sizes = [8, 64], strides = [1, 1]} : vector<8x192xf32> to vector<8x64xf32>
    %cst_22 = arith.constant dense<0.000000e+00> : vector<8x128xf32>
    %29 = tpu.matmul %28, %23, %cst_22 {dimension_numbers = #tpu.dot_dimension_numbers<[1], [0], [0], [1], [0, 0, 1, 1], [], []>} : vector<8x64xf32>, vector<64x128xf32>, vector<8x128xf32> -> vector<8x128xf32>
    %c127_i32_23 = arith.constant 127 : i32
    %30 = tpu.dynamic_rotate %29 by %c127_i32_23 dim 1 : vector<8x128xf32>, i32 -> vector<8x128xf32>
    %31 = arith.addf %27, %30 : vector<8x128xf32>
    %32 = vector.extract_strided_slice %25 {offsets = [0, 128], sizes = [8, 64], strides = [1, 1]} : vector<8x192xf32> to vector<8x64xf32>
    %cst_24 = arith.constant dense<0.000000e+00> : vector<8x128xf32>
    %33 = tpu.matmul %32, %23, %cst_24 {dimension_numbers = #tpu.dot_dimension_numbers<[1], [0], [0], [1], [0, 0, 1, 1], [], []>} : vector<8x64xf32>, vector<64x128xf32>, vector<8x128xf32> -> vector<8x128xf32>
    %c126_i32_25 = arith.constant 126 : i32
    %34 = tpu.dynamic_rotate %33 by %c126_i32_25 dim 1 : vector<8x128xf32>, i32 -> vector<8x128xf32>
    %35 = arith.addf %31, %34 : vector<8x128xf32>
    %c0_26 = arith.constant 0 : index
    %c0_27 = arith.constant 0 : index
    %c0_28 = arith.constant 0 : index
    %36 = vector.load %arg6[%c0_26, %c0_27, %c0_28] : memref<2x8x1xf32, #tpu.memory_space<vmem>>, vector<1x8x1xf32>
    %37 = vector.shape_cast %36 : vector<1x8x1xf32> to vector<8x1xf32>
    %38 = vector.broadcast %37 : vector<8x1xf32> to vector<8x128xf32>
    %39 = arith.addf %35, %38 : vector<8x128xf32>
    %40 = math.tanh %39 : vector<8x128xf32>
    %41 = vector.extract_strided_slice %1 {offsets = [4, 0], sizes = [4, 128], strides = [1, 1]} : vector<8x128xf32> to vector<4x128xf32>
    %42 = vector.extract_strided_slice %1 {offsets = [0, 0], sizes = [4, 128], strides = [1, 1]} : vector<8x128xf32> to vector<4x128xf32>
    %43 = tpu.concatenate %41, %42 in 0 : vector<4x128xf32>, vector<4x128xf32> -> vector<8x128xf32>
    %c125_i32_29 = arith.constant 125 : i32
    %44 = tpu.dynamic_rotate %43 by %c125_i32_29 dim 1 : vector<8x128xf32>, i32 -> vector<8x128xf32>
    %45 = math.exp %40 : vector<8x128xf32>
    %46 = arith.mulf %44, %45 : vector<8x128xf32>
    %c0_30 = arith.constant 0 : index
    %c0_31 = arith.constant 0 : index
    %47 = vector.load %arg2[%c0_30, %c0_31] : memref<1x128xi32, #tpu.memory_space<vmem>>, vector<1x128xi32>
    %c1_i32 = arith.constant 1 : i32
    %48 = vector.broadcast %c1_i32 : i32 to vector<1x128xi32>
    %49 = arith.cmpi eq, %47, %48 : vector<1x128xi32>
    %c1_i32_32 = arith.constant 1 : i32
    %50 = tpu.dynamic_rotate %46 by %c1_i32_32 dim 1 : vector<8x128xf32>, i32 -> vector<8x128xf32>
    %51 = vector.shape_cast %49 : vector<1x128xi1> to vector<1x128xi1>
    %52 = vector.broadcast %51 : vector<1x128xi1> to vector<8x128xi1>
    %53 = arith.select %52, %50, %46 : vector<8x128xi1>, vector<8x128xf32>
    %c2_i32 = arith.constant 2 : i32
    %54 = vector.broadcast %c2_i32 : i32 to vector<1x128xi32>
    %55 = arith.cmpi eq, %47, %54 : vector<1x128xi32>
    %c2_i32_33 = arith.constant 2 : i32
    %56 = tpu.dynamic_rotate %46 by %c2_i32_33 dim 1 : vector<8x128xf32>, i32 -> vector<8x128xf32>
    %57 = vector.shape_cast %55 : vector<1x128xi1> to vector<1x128xi1>
    %58 = vector.broadcast %57 : vector<1x128xi1> to vector<8x128xi1>
    %59 = arith.select %58, %56, %53 : vector<8x128xi1>, vector<8x128xf32>
    %c3_i32 = arith.constant 3 : i32
    %60 = vector.broadcast %c3_i32 : i32 to vector<1x128xi32>
    %61 = arith.cmpi eq, %47, %60 : vector<1x128xi32>
    %c3_i32_34 = arith.constant 3 : i32
    %62 = tpu.dynamic_rotate %46 by %c3_i32_34 dim 1 : vector<8x128xf32>, i32 -> vector<8x128xf32>
    %63 = vector.shape_cast %61 : vector<1x128xi1> to vector<1x128xi1>
    %64 = vector.broadcast %63 : vector<1x128xi1> to vector<8x128xi1>
    %65 = arith.select %64, %62, %59 : vector<8x128xi1>, vector<8x128xf32>
    %c4_i32 = arith.constant 4 : i32
    %66 = vector.broadcast %c4_i32 : i32 to vector<1x128xi32>
    %67 = arith.cmpi eq, %47, %66 : vector<1x128xi32>
    %c4_i32_35 = arith.constant 4 : i32
    %68 = tpu.dynamic_rotate %46 by %c4_i32_35 dim 1 : vector<8x128xf32>, i32 -> vector<8x128xf32>
    %69 = vector.shape_cast %67 : vector<1x128xi1> to vector<1x128xi1>
    %70 = vector.broadcast %69 : vector<1x128xi1> to vector<8x128xi1>
    %71 = arith.select %70, %68, %65 : vector<8x128xi1>, vector<8x128xf32>
    %c5_i32 = arith.constant 5 : i32
    %72 = vector.broadcast %c5_i32 : i32 to vector<1x128xi32>
    %73 = arith.cmpi eq, %47, %72 : vector<1x128xi32>
    %c5_i32_36 = arith.constant 5 : i32
    %74 = tpu.dynamic_rotate %46 by %c5_i32_36 dim 1 : vector<8x128xf32>, i32 -> vector<8x128xf32>
    %75 = vector.shape_cast %73 : vector<1x128xi1> to vector<1x128xi1>
    %76 = vector.broadcast %75 : vector<1x128xi1> to vector<8x128xi1>
    %77 = arith.select %76, %74, %71 : vector<8x128xi1>, vector<8x128xf32>
    %c6_i32 = arith.constant 6 : i32
    %78 = vector.broadcast %c6_i32 : i32 to vector<1x128xi32>
    %79 = arith.cmpi eq, %47, %78 : vector<1x128xi32>
    %c6_i32_37 = arith.constant 6 : i32
    %80 = tpu.dynamic_rotate %46 by %c6_i32_37 dim 1 : vector<8x128xf32>, i32 -> vector<8x128xf32>
    %81 = vector.shape_cast %79 : vector<1x128xi1> to vector<1x128xi1>
    %82 = vector.broadcast %81 : vector<1x128xi1> to vector<8x128xi1>
    %83 = arith.select %82, %80, %77 : vector<8x128xi1>, vector<8x128xf32>
    %c0_38 = arith.constant 0 : index
    %c0_39 = arith.constant 0 : index
    %84 = vector.load %arg8[%c0_38, %c0_39] : memref<40x128xf32, #tpu.memory_space<vmem>>, vector<8x128xf32>
    tpu.vector_store %arg8[%c0_38, %c0_39], %83 {strides = array<i32>} : memref<40x128xf32, #tpu.memory_space<vmem>>, vector<8x128xf32>,
    %c127_i32_40 = arith.constant 127 : i32
    %85 = tpu.dynamic_rotate %83 by %c127_i32_40 dim 1 : vector<8x128xf32>, i32 -> vector<8x128xf32>
    %c8_41 = arith.constant 8 : index
    %c0_42 = arith.constant 0 : index
    %86 = vector.load %arg8[%c8_41, %c0_42] : memref<40x128xf32, #tpu.memory_space<vmem>>, vector<8x128xf32>
    tpu.vector_store %arg8[%c8_41, %c0_42], %85 {strides = array<i32>} : memref<40x128xf32, #tpu.memory_space<vmem>>, vector<8x128xf32>,
    %c126_i32_43 = arith.constant 126 : i32
    %87 = tpu.dynamic_rotate %83 by %c126_i32_43 dim 1 : vector<8x128xf32>, i32 -> vector<8x128xf32>
    %c16_44 = arith.constant 16 : index
    %c0_45 = arith.constant 0 : index
    %88 = vector.load %arg8[%c16_44, %c0_45] : memref<40x128xf32, #tpu.memory_space<vmem>>, vector<8x128xf32>
    tpu.vector_store %arg8[%c16_44, %c0_45], %87 {strides = array<i32>} : memref<40x128xf32, #tpu.memory_space<vmem>>, vector<8x128xf32>,
    %c125_i32_46 = arith.constant 125 : i32
    %89 = tpu.dynamic_rotate %83 by %c125_i32_46 dim 1 : vector<8x128xf32>, i32 -> vector<8x128xf32>
    %c24_47 = arith.constant 24 : index
    %c0_48 = arith.constant 0 : index
    %90 = vector.load %arg8[%c24_47, %c0_48] : memref<40x128xf32, #tpu.memory_space<vmem>>, vector<8x128xf32>
    tpu.vector_store %arg8[%c24_47, %c0_48], %89 {strides = array<i32>} : memref<40x128xf32, #tpu.memory_space<vmem>>, vector<8x128xf32>,
    %c124_i32_49 = arith.constant 124 : i32
    %91 = tpu.dynamic_rotate %83 by %c124_i32_49 dim 1 : vector<8x128xf32>, i32 -> vector<8x128xf32>
    %c32_50 = arith.constant 32 : index
    %c0_51 = arith.constant 0 : index
    %92 = vector.load %arg8[%c32_50, %c0_51] : memref<40x128xf32, #tpu.memory_space<vmem>>, vector<8x128xf32>
    tpu.vector_store %arg8[%c32_50, %c0_51], %91 {strides = array<i32>} : memref<40x128xf32, #tpu.memory_space<vmem>>, vector<8x128xf32>,
    %c1 = arith.constant 1 : index
    %c0_52 = arith.constant 0 : index
    %c0_53 = arith.constant 0 : index
    %93 = vector.load %arg3[%c1, %c0_52, %c0_53] : memref<2x64x40xf32, #tpu.memory_space<vmem>>, vector<1x64x40xf32>
    %94 = vector.shape_cast %93 : vector<1x64x40xf32> to vector<64x40xf32>
    %c0_54 = arith.constant 0 : index
    %c0_55 = arith.constant 0 : index
    %95 = vector.load %arg8[%c0_54, %c0_55] : memref<40x128xf32, #tpu.memory_space<vmem>>, vector<40x128xf32>
    %cst_56 = arith.constant dense<0.000000e+00> : vector<64x128xf32>
    %96 = tpu.matmul %94, %95, %cst_56 {dimension_numbers = #tpu.dot_dimension_numbers<[1], [0], [0], [1], [0, 0, 1, 1], [], []>} : vector<64x40xf32>, vector<40x128xf32>, vector<64x128xf32> -> vector<64x128xf32>
    %c1_57 = arith.constant 1 : index
    %c0_58 = arith.constant 0 : index
    %c0_59 = arith.constant 0 : index
    %97 = vector.load %arg4[%c1_57, %c0_58, %c0_59] : memref<2x64x1xf32, #tpu.memory_space<vmem>>, vector<1x64x1xf32>
    %98 = vector.shape_cast %97 : vector<1x64x1xf32> to vector<64x1xf32>
    %99 = vector.broadcast %98 : vector<64x1xf32> to vector<64x128xf32>
    %100 = arith.addf %96, %99 : vector<64x128xf32>
    %cst_60 = arith.constant 0.000000e+00 : f32
    %101 = vector.broadcast %cst_60 : f32 to vector<64x128xf32>
    %102 = arith.cmpf ogt, %100, %101 : vector<64x128xf32>
    %cst_61 = arith.constant 0.00999999977 : f32
    %103 = vector.broadcast %cst_61 : f32 to vector<64x128xf32>
    %104 = arith.mulf %103, %100 : vector<64x128xf32>
    %105 = arith.select %102, %100, %104 : vector<64x128xi1>, vector<64x128xf32>
    %c1_62 = arith.constant 1 : index
    %c0_63 = arith.constant 0 : index
    %c0_64 = arith.constant 0 : index
    %106 = vector.load %arg5[%c1_62, %c0_63, %c0_64] : memref<2x8x192xf32, #tpu.memory_space<vmem>>, vector<1x8x192xf32>
    %107 = vector.shape_cast %106 : vector<1x8x192xf32> to vector<8x192xf32>
    %108 = vector.extract_strided_slice %107 {offsets = [0, 0], sizes = [8, 64], strides = [1, 1]} : vector<8x192xf32> to vector<8x64xf32>
    %cst_65 = arith.constant dense<0.000000e+00> : vector<8x128xf32>
    %109 = tpu.matmul %108, %105, %cst_65 {dimension_numbers = #tpu.dot_dimension_numbers<[1], [0], [0], [1], [0, 0, 1, 1], [], []>} : vector<8x64xf32>, vector<64x128xf32>, vector<8x128xf32> -> vector<8x128xf32>
    %110 = vector.extract_strided_slice %107 {offsets = [0, 64], sizes = [8, 64], strides = [1, 1]} : vector<8x192xf32> to vector<8x64xf32>
    %cst_66 = arith.constant dense<0.000000e+00> : vector<8x128xf32>
    %111 = tpu.matmul %110, %105, %cst_66 {dimension_numbers = #tpu.dot_dimension_numbers<[1], [0], [0], [1], [0, 0, 1, 1], [], []>} : vector<8x64xf32>, vector<64x128xf32>, vector<8x128xf32> -> vector<8x128xf32>
    %c127_i32_67 = arith.constant 127 : i32
    %112 = tpu.dynamic_rotate %111 by %c127_i32_67 dim 1 : vector<8x128xf32>, i32 -> vector<8x128xf32>
    %113 = arith.addf %109, %112 : vector<8x128xf32>
    %114 = vector.extract_strided_slice %107 {offsets = [0, 128], sizes = [8, 64], strides = [1, 1]} : vector<8x192xf32> to vector<8x64xf32>
    %cst_68 = arith.constant dense<0.000000e+00> : vector<8x128xf32>
    %115 = tpu.matmul %114, %105, %cst_68 {dimension_numbers = #tpu.dot_dimension_numbers<[1], [0], [0], [1], [0, 0, 1, 1], [], []>} : vector<8x64xf32>, vector<64x128xf32>, vector<8x128xf32> -> vector<8x128xf32>
    %c126_i32_69 = arith.constant 126 : i32
    %116 = tpu.dynamic_rotate %115 by %c126_i32_69 dim 1 : vector<8x128xf32>, i32 -> vector<8x128xf32>
    %117 = arith.addf %113, %116 : vector<8x128xf32>
    %c1_70 = arith.constant 1 : index
    %c0_71 = arith.constant 0 : index
    %c0_72 = arith.constant 0 : index
    %118 = vector.load %arg6[%c1_70, %c0_71, %c0_72] : memref<2x8x1xf32, #tpu.memory_space<vmem>>, vector<1x8x1xf32>
    %119 = vector.shape_cast %118 : vector<1x8x1xf32> to vector<8x1xf32>
    %120 = vector.broadcast %119 : vector<8x1xf32> to vector<8x128xf32>
    %121 = arith.addf %117, %120 : vector<8x128xf32>
    %122 = math.tanh %121 : vector<8x128xf32>
    %123 = vector.extract_strided_slice %46 {offsets = [4, 0], sizes = [4, 128], strides = [1, 1]} : vector<8x128xf32> to vector<4x128xf32>
    %124 = vector.extract_strided_slice %122 {offsets = [0, 0], sizes = [4, 128], strides = [1, 1]} : vector<8x128xf32> to vector<4x128xf32>
    %125 = arith.addf %123, %124 : vector<4x128xf32>
    %126 = vector.extract_strided_slice %46 {offsets = [0, 0], sizes = [4, 128], strides = [1, 1]} : vector<8x128xf32> to vector<4x128xf32>
    %127 = vector.extract_strided_slice %122 {offsets = [4, 0], sizes = [4, 128], strides = [1, 1]} : vector<8x128xf32> to vector<4x128xf32>
    %128 = arith.subf %126, %127 : vector<4x128xf32>
    %129 = tpu.concatenate %125, %128 in 0 : vector<4x128xf32>, vector<4x128xf32> -> vector<8x128xf32>
    %c0_73 = arith.constant 0 : index
    %c0_74 = arith.constant 0 : index
    %c0_75 = arith.constant 0 : index
    %130 = vector.load %arg7[%c0_73, %c0_74, %c0_75] : memref<1x8x128xf32, #tpu.memory_space<vmem>>, vector<1x8x128xf32>
    %131 = vector.shape_cast %130 : vector<1x8x128xf32> to vector<8x128xf32>
    %132 = vector.shape_cast %129 : vector<8x128xf32> to vector<1x8x128xf32>
    tpu.vector_store %arg7[%c0_73, %c0_74, %c0_75], %132 {strides = array<i32>} : memref<1x8x128xf32, #tpu.memory_space<vmem>>, vector<1x8x128xf32>,
    return
  }
  func.func @transform_0(%arg0: i32) -> (i32, i32, i32) {
    %c0_i32 = arith.constant 0 : i32
    %c0_i32_0 = arith.constant 0 : i32
    %c0_i32_1 = arith.constant 0 : i32
    return %arg0, %c0_i32, %c0_i32_0 : i32, i32, i32
  }
  func.func @transform_1(%arg0: i32) -> (i32, i32) {
    %c0_i32 = arith.constant 0 : i32
    %c0_i32_0 = arith.constant 0 : i32
    %c0_i32_1 = arith.constant 0 : i32
    return %c0_i32, %c0_i32_0 : i32, i32
  }
  func.func @transform_2(%arg0: i32) -> (i32, i32, i32) {
    %c0_i32 = arith.constant 0 : i32
    %c0_i32_0 = arith.constant 0 : i32
    %c0_i32_1 = arith.constant 0 : i32
    %c0_i32_2 = arith.constant 0 : i32
    return %c0_i32, %c0_i32_0, %c0_i32_1 : i32, i32, i32
  }
  func.func @transform_3(%arg0: i32) -> (i32, i32, i32) {
    %c0_i32 = arith.constant 0 : i32
    %c0_i32_0 = arith.constant 0 : i32
    %c0_i32_1 = arith.constant 0 : i32
    %c0_i32_2 = arith.constant 0 : i32
    return %c0_i32, %c0_i32_0, %c0_i32_1 : i32, i32, i32
  }
  func.func @transform_4(%arg0: i32) -> (i32, i32, i32) {
    %c0_i32 = arith.constant 0 : i32
    %c0_i32_0 = arith.constant 0 : i32
    %c0_i32_1 = arith.constant 0 : i32
    %c0_i32_2 = arith.constant 0 : i32
    return %c0_i32, %c0_i32_0, %c0_i32_1 : i32, i32, i32
  }
  func.func @transform_5(%arg0: i32) -> (i32, i32, i32) {
    %c0_i32 = arith.constant 0 : i32
    %c0_i32_0 = arith.constant 0 : i32
    %c0_i32_1 = arith.constant 0 : i32
    %c0_i32_2 = arith.constant 0 : i32
    return %c0_i32, %c0_i32_0, %c0_i32_1 : i32, i32, i32
  }
  func.func @transform_6(%arg0: i32) -> (i32, i32, i32) {
    %c0_i32 = arith.constant 0 : i32
    %c0_i32_0 = arith.constant 0 : i32
    %c0_i32_1 = arith.constant 0 : i32
    return %arg0, %c0_i32, %c0_i32_0 : i32, i32, i32
  }
}

</mosaic_0001>

<bundles_post_ra>
// kernel: tpu_custom_call.1
= control target key start
LH: loop header
LB: loop body
LE: loop exit
PB: predicated region body
PF: predicated region fallthrough
CT: control target
= control target key end

     0   :  { %11 = vsyncpa [#allocation4], 0  ;;  %s2214_s0 = inlined_call_operand.vmem [shape: f32[2,8,128], index: 0, kind: input, shape index: {}]   ;;  %s2215_s1 = inlined_call_operand.vmem [shape: s32[1,128], index: 1, kind: input, shape index: {}]   ;;  %s2216_s2 = inlined_call_operand.vmem [shape: f32[2,64,40], index: 2, kind: input, shape index: {}]   ;;  %s2217_s3 = inlined_call_operand.vmem [shape: f32[2,64,1], index: 3, kind: input, shape index: {}]   ;;  %s2218_s4 = inlined_call_operand.vmem [shape: f32[2,8,192], index: 4, kind: input, shape index: {}]   ;;  %s2219_s5 = inlined_call_operand.vmem [shape: f32[2,8,1], index: 5, kind: input, shape index: {}]   ;;  %s2220_s6 = inlined_call_operand.hbm [shape: f32[2,8,128], index: 6, kind: output, shape index: {}]  }
   0x1   :  { %13 = vsyncpa [#allocation4 + $0x1], 0  ;;  %s1889_s21 = smov 0   ;;  %s1891_s22 = smov 0  }
   0x2   :  { %s1893_s23 = smov 0   ;;  %s1895_s24 = smov 0  }
   0x3 LB: > { %s1910_s25 = sadd.s32 4294967295, %s1836_s24   ;;  %s1335_s26 = sadd.s32 4294967294, %s1836_s24   ;;  %s1836_s24 = sphi %s1895_s24, %s2226_s24   ;;  %s1832_s23 = sphi %s1893_s23, %s2225_s23   ;;  %s1828_s22 = sphi %s1891_s22, %s2224_s22   ;;  %s1824_s21 = sphi %s1889_s21, %s2223_s21  }
   0x4   : > { %s1914_s27 = sadd.s32 1, %s1836_s24   ;;  %s157_s28 = sadd.s32 1, %s1832_s23 }
   0x5   : > { %s154_s29 = ssub.s32 %s1836_s24, %s1914_s27  ;;  %p167_p0 = scmp.ne.s32.totalorder %s1832_s23, %s1828_s22 }
   0x6   : > { %p155_p1 = scmp.eq.s32.totalorder %s154_s29, 0  ;;  %p168_p2 = scmp.eq.s32.totalorder %s1910_s25, 1 }
   0x7   : > { %p173_p3 = scmp.ne.s32.totalorder %s1828_s22, %s1824_s21  ;;  %p174_p4 = scmp.eq.s32.totalorder %s1335_s26, 1 }
   0x8   : > { %s1925_s30 = scalar_select %p155_p1, %s1832_s23, %s157_s28  }
   0x9   : > { %p1927_p5 = por %p168_p2, %p167_p0  ;;  %p1931_p6 = por %p174_p4, %p173_p3 }
   0xa   : > { %p1338_p7 = scmp.ge.s32.totalorder %s1836_s24, 1  ;;  %p214_p8 = scmp.lt.s32.totalorder %s1836_s24, 3 }
   0xc   : > { %p215_p9 = pnand %p1338_p7, %p214_p8 }
   0xd   : > { %p243_p10 = scmp.lt.s32.totalorder (!%p215_p9), %s1910_s25, 1  ;;  %v261_v0 = vld [vmem:[%s2216_s2] sm:$0xff] (!%p215_p9)  ;;  %vm322_vm0 = vcmask (!%p215_p9), 326656   ;;  %s1838_s16 = smov (!%p215_p9), 127   ;;  %v275_v3 = vld [vmem:[%s2217_s3 + $0x8] sm:$0xff] (!%p215_p9)  ;;  %v1842_v4 = vmov (!%p215_p9), 0  }
   0xe   : > { %218 = sbr.rel (%p215_p9) target bundleno = 1627 (0x65b), region = 44  ;;  %1476 = vmatprep.mubr.msk.f32.mxu0 (!%p215_p9), %vm322_vm0, %v261_v0  ;;  %s1839_s17 = smov (!%p215_p9), 125   ;;  %v274_v2 = vld [vmem:[%s2217_s3] sm:$0xff] (!%p215_p9)  ;;  %1766 = vset.pattern.permute.xlu0 (!%p215_p9), %v1842_v4  ;;  %v277_v5 = vld [vmem:[%s2217_s3 + $0x18] sm:$0xff] (!%p215_p9)  ;;  %v276_v6 = vld [vmem:[%s2217_s3 + $0x10] sm:$0xff] (!%p215_p9)  ;;  %v1844_v26 = vmov (!%p215_p9), 0.0|0.0  }
   0xf   : > { %s1840_s18 = smov (!%p215_p9), 126   ;;  %s1841_s19 = smov (!%p215_p9), 124   ;;  %1767 = vset.pattern.permute.xlu1 (!%p215_p9), %v1842_v4  ;;  %v279_v7 = vld [vmem:[%s2217_s3 + $0x28] sm:$0xff] (!%p215_p9)  ;;  %v278_v8 = vld [vmem:[%s2217_s3 + $0x20] sm:$0xff] (!%p215_p9)  ;;  %v281_v9 = vld [vmem:[%s2217_s3 + $0x38] sm:$0xff] (!%p215_p9)  ;;  %1632 = vmatprep.subr.bf16.mxu1 (!%p215_p9), %v1844_v26  ;;  %vm1845_vm1 = vmmov (!%p215_p9), 0  }
  0x10   : > { %v280_v10 = vld [vmem:[%s2217_s3 + $0x30] sm:$0xff] (!%p215_p9)  ;;  %v704_v11 = vld [vmem:[%s2219_s5] sm:$0xff] (!%p215_p9)  ;;  %s1843_s14 = smov (!%p215_p9), 64   ;;  %v262_v19 = vld [vmem:[%s2216_s2 + $0x8] sm:$0xff] (!%p215_p9)  ;;  %v1846_v27 = vmov (!%p215_p9), 0.0   ;;  %vm481_vm10 = vcmask (!%p215_p9), 523264  }
  0x11   : > { %v1988_v12 = vld [vmem:[%s2218_s4] sm:$0xff] (!%p215_p9)  ;;  %v263_v20 = vld [vmem:[%s2216_s2 + $0x10] sm:$0xff] (!%p215_p9)  ;;  %v264_v21 = vld [vmem:[%s2216_s2 + $0x18] sm:$0xff] (!%p215_p9)  ;;  %1504 = vmatprep.mubr.msk.f32.mxu1 (!%p215_p9), %vm1845_vm1, %v1846_v27  ;;  %s1848_s11 = smov (!%p215_p9), 1   ;;  %s1849_s12 = smov (!%p215_p9), 4  }
  0x12   : > { %v265_v22 = vld [vmem:[%s2216_s2 + $0x20] sm:$0xff] (!%p215_p9)  ;;  %v266_v23 = vld [vmem:[%s2216_s2 + $0x28] sm:$0xff] (!%p215_p9)  ;;  %v267_v24 = vld [vmem:[%s2216_s2 + $0x30] sm:$0xff] (!%p215_p9)  ;;  %s1850_s13 = smov (!%p215_p9), 3   ;;  %s1852_s20 = smov (!%p215_p9), 5  }
  0x13   : > { %v268_v25 = vld [vmem:[%s2216_s2 + $0x38] sm:$0xff] (!%p215_p9) }
  0x15   : > { %s244_s9 = scalar_select %p243_p10, %s1910_s25, 1 }
  0x17   : > { %s1340_s10 = sshll.u32 %s244_s9, 3  ;;  %s240_s9 = sand.u32 1, %s1828_s22  }
  0x18   : > { %s246_s15 = scalar_lea.vmem %s2214_s0, %s1340_s10  ;;  %s1847_s10 = smov 2  }
  0x19   : > { %v1946_v1 = vld [vmem:[%s246_s15] sm:$0xff]  ;;  %s1851_s15 = smov 6  }
  0x1a   : > { %249 = vrot.lane.b32.xlu0 %v1946_v1, %s1838_s16  ;;  %255 = vrot.lane.b32.xlu1 %v1946_v1, %s1839_s17 }
  0x1e   : > { %252 = vrot.lane.b32.xlu0 %v1946_v1, %s1840_s18  ;;  %258 = vrot.lane.b32.xlu1 %v1946_v1, %s1841_s19 }
  0x22   : > { %284 = vperm.xlu0 %1766, %v274_v2   ;;  %289 = vperm.xlu1 %1767, %v275_v3  }
  0x26   : > { %299 = vperm.xlu0 %1766, %v277_v5   ;;  %294 = vperm.xlu1 %1767, %v276_v6  }
  0x2a   : > { %309 = vperm.xlu0 %1766, %v279_v7   ;;  %304 = vperm.xlu1 %1767, %v278_v8  }
  0x2e   : > { %319 = vperm.xlu0 %1766, %v281_v9   ;;  %314 = vperm.xlu1 %1767, %v280_v10  }
  0x32   : > { %707 = vperm.xlu0 %1766, %v704_v11   ;;  %479 = vrot.lane.b32.xlu1 %v1988_v12, %s1843_s14  ;;  %v477_v11 = vld [vmem:[%s2218_s4 + $0x8] sm:$0xff] }
  0x8c   : > { %v250_v13 = vpop.permute.xlu0 %249  ;;  %v256_v15 = vpop.permute.xlu1 %255 }
  0x8d   : > { %v1624_v14 = vpack.c.bf16 %v250_v13, %v1946_v1 }
  0x8f   : > { %1625 = vmatprep.subr.bf16.mxu0 %v1624_v14 }
  0x90   : > { %1627 = vmatpush3.bf16.msra.mxu0 %v1624_v14  ;;  %v253_v16 = vpop.permute.xlu0 %252  ;;  %v259_v18 = vpop.permute.xlu1 %258 }
  0x91   : > { %v1628_v17 = vpack.c.bf16 %v256_v15, %v253_v16  ;;  %v713_v15 = vrot.slane %v1946_v1, 4 }
  0x93   : > { %1629 = vmatprep.subr.bf16.mxu0 %v1628_v17 }
  0x94   : > { %1631 = vmatpush3.bf16.msra.mxu0 %v1628_v17 }
  0x95   : > { %1474 = vmatprep.subr.mxu0 %v259_v18 }
  0x98   : > { %1475 = vmatpush3.msra.mxu0 %v259_v18 }
  0x99   : > { %1477 = vmatmul.mubr.msk.f32.vlgmr.msra.gmra.mrb[0].mxu0 %vm322_vm0, %v262_v19  ;;  %1644 = vmatprep.subr.bf16.mxu0 %v1844_v26 }
  0x9a   : > { %1479 = vmatprep.mubr.msk.f32.mxu0 %vm322_vm0, %v263_v20 }
  0x9d   : > { %1480 = vmatmul.mubr.msk.f32.gmra.mrb[2].mxu0 %vm322_vm0, %v264_v21 }
  0x9e   : > { %1482 = vmatprep.mubr.msk.f32.mxu0 %vm322_vm0, %v265_v22 }
  0xa1   : > { %1483 = vmatmul.mubr.msk.f32.gmra.mrb[4].mxu0 %vm322_vm0, %v266_v23  ;;  %v285_v28 = vpop.permute.xlu0 %284  ;;  %v290_v29 = vpop.permute.xlu1 %289 }
  0xa2   : > { %1485 = vmatprep.mubr.msk.f32.mxu0 %vm322_vm0, %v267_v24 }
  0xa5   : > { %1486 = vmatmul.mubr.msk.f32.gmra.mrb[6].mxu0 %vm322_vm0, %v268_v25  ;;  %v300_v30 = vpop.permute.xlu0 %299  ;;  %v295_v32 = vpop.permute.xlu1 %294 }
  0xa6   : > { %1523 = vmatprep.mubr.msk.f32.mxu0 %vm1845_vm1, %v1846_v27 }
  0xa9   : > { %v310_v42 = vpop.permute.xlu0 %309  ;;  %v305_v45 = vpop.permute.xlu1 %304 }
  0xad   : > { %v320_v57 = vpop.permute.xlu0 %319  ;;  %v315_v60 = vpop.permute.xlu1 %314 }
  0xb1   : > { %v480_v10 = vpop.permute.xlu1 %479  ;;  %v708_v19 = vpop.permute.xlu0 %707 }
 0x16c   : > { %v1478_v31 = vpop.f32.mrb[0].mxu0 }
 0x16d   : > { %v419_v33 = vadd.f32 %v1478_v31, %v290_v29  ;;  %v413_v34 = vpop.f32.mrb[1].mxu0  ;;  %v727_v31 = vlaneseq }
 0x16e   : > { %v414_v35 = vadd.f32 %v413_v34, %v285_v28 }
 0x16f   : > { %vm453_vm2 = vcmp.gt.f32.partialorder %v419_v33, 0.0  ;;  %v461_v36 = vmul.f32 0.01, %v419_v33 }
 0x170   : > { %vm452_vm3 = vcmp.gt.f32.partialorder %v414_v35, 0.0  ;;  %v460_v37 = vmul.f32 0.01, %v414_v35  ;;  %v1481_v38 = vpop.f32.mrb[2].mxu0 }
 0x171   : > { %v429_v39 = vadd.f32 %v1481_v38, %v300_v30  ;;  %v423_v40 = vpop.f32.mrb[3].mxu0  ;;  %v469_v41 = vsel %vm453_vm2, %v419_v33, %v461_v36  ;;  %v728_v33 = vshrl.u32 %v727_v31, 7 }
 0x172   : > { %v424_v43 = vadd.f32 %v423_v40, %v295_v32  ;;  %v468_v44 = vsel %vm452_vm3, %v414_v35, %v460_v37  ;;  %v722_v32 = vld [vmem:[%s2215_s1] sm:$0x1] }
 0x173   : > { %vm455_vm4 = vcmp.gt.f32.partialorder %v429_v39, 0.0  ;;  %v463_v46 = vmul.f32 0.01, %v429_v39  ;;  %v1633_v47 = vpack.c.bf16 %v469_v41, %v468_v44  ;;  %vm723_vm11 = vcmp.eq.s32.totalorder %v722_v32, 1 }
 0x174   : > { %vm454_vm5 = vcmp.gt.f32.partialorder %v424_v43, 0.0  ;;  %v462_v48 = vmul.f32 0.01, %v424_v43  ;;  %v1484_v49 = vpop.f32.mrb[4].mxu0  ;;  %v729_v34 = vsub.s32 0, %v728_v33  ;;  %v726_v35 = vsel %vm723_vm11, 1, %v1842_v4 }
 0x175   : > { %v439_v50 = vadd.f32 %v1484_v49, %v310_v42  ;;  %v433_v51 = vpop.f32.mrb[5].mxu0  ;;  %1634 = vmatpush3.bf16.msra.mxu1 %v1633_v47  ;;  %1646 = vmatpush3.bf16.msra.mxu0 %v1633_v47  ;;  %v471_v52 = vsel %vm455_vm4, %v429_v39, %v463_v46  ;;  %vm733_vm12 = vcmp.eq.s32.totalorder %v722_v32, 2  ;;  %vm743_vm13 = vcmp.eq.s32.totalorder %v722_v32, 3 }
 0x176   : > { %v434_v53 = vadd.f32 %v433_v51, %v305_v45  ;;  %1635 = vmatprep.subr.bf16.mxu1 %v1844_v26  ;;  %1647 = vmatprep.subr.bf16.mxu0 %v1844_v26  ;;  %v470_v54 = vsel %vm454_vm5, %v424_v43, %v462_v48  ;;  %v730_v36 = vrot.slane %v726_v35, %v729_v34  ;;  %v736_v37 = vsel %vm733_vm12, 1, %v1842_v4 }
 0x177   : > { %vm457_vm6 = vcmp.gt.f32.partialorder %v439_v50, 0.0  ;;  %v465_v55 = vmul.f32 0.01, %v439_v50  ;;  %v1636_v56 = vpack.c.bf16 %v471_v52, %v470_v54  ;;  %v746_v38 = vsel %vm743_vm13, 1, %v1842_v4 }
 0x178   : > { %vm456_vm7 = vcmp.gt.f32.partialorder %v434_v53, 0.0  ;;  %v464_v58 = vmul.f32 0.01, %v434_v53  ;;  %v1487_v59 = vpop.f32.mrb[6].mxu0  ;;  %vm753_vm14 = vcmp.eq.s32.totalorder %v722_v32, 4  ;;  %vm763_vm15 = vcmp.eq.s32.totalorder %v722_v32, 5 }
 0x179   : > { %v449_v61 = vadd.f32 %v1487_v59, %v320_v57  ;;  %v443_v62 = vpop.f32.mrb[7].mxu0  ;;  %1637 = vmatpush3.bf16.msra.mxu1 %v1636_v56  ;;  %1649 = vmatpush3.bf16.msra.mxu0 %v1636_v56  ;;  %v473_v63 = vsel %vm457_vm6, %v439_v50, %v465_v55  ;;  %v740_v39 = vrot.slane %v736_v37, %v729_v34  ;;  %vm773_vm2 = vcmp.eq.s32.totalorder %v722_v32, 6  ;;  %v1361_v59 = vld [vmem:[%s2217_s3 + $0x48] sm:$0xff] }
 0x17a   : > { %v444_v0 = vadd.f32 %v443_v62, %v315_v60  ;;  %1638 = vmatprep.subr.bf16.mxu1 %v1844_v26  ;;  %1650 = vmatprep.subr.bf16.mxu0 %v1844_v26  ;;  %v472_v2 = vsel %vm456_vm7, %v434_v53, %v464_v58  ;;  %vm731_vm3 = vcmp.eq.s32.totalorder %v730_v36, 1  ;;  %v750_v40 = vrot.slane %v746_v38, %v729_v34  ;;  %v1360_v60 = vld [vmem:[%s2217_s3 + $0x40] sm:$0xff]  ;;  %v1362_v62 = vld [vmem:[%s2217_s3 + $0x50] sm:$0xff] }
 0x17b   : > { %vm459_vm8 = vcmp.gt.f32.partialorder %v449_v61, 0.0  ;;  %v467_v3 = vmul.f32 0.01, %v449_v61  ;;  %v1639_v5 = vpack.c.bf16 %v473_v63, %v472_v2  ;;  %v756_v41 = vsel %vm753_vm14, 1, %v1842_v4  ;;  %v1365_v63 = vld [vmem:[%s2217_s3 + $0x68] sm:$0xff]  ;;  %v1367_v2 = vld [vmem:[%s2217_s3 + $0x78] sm:$0xff] }
 0x17c   : > { %vm458_vm9 = vcmp.gt.f32.partialorder %v444_v0, 0.0  ;;  %v466_v6 = vmul.f32 0.01, %v444_v0  ;;  %v766_v42 = vsel %vm763_vm15, 1, %v1842_v4  ;;  %v776_v45 = vsel %vm773_vm2, 1, %v1842_v4  ;;  %v1352_v4 = vld [vmem:[%s2216_s2 + $0x40] sm:$0xff] }
 0x17d   : > { %1640 = vmatpush3.bf16.msra.mxu1 %v1639_v5  ;;  %1652 = vmatpush3.bf16.msra.mxu0 %v1639_v5  ;;  %v475_v7 = vsel %vm459_vm8, %v449_v61, %v467_v3  ;;  %vm741_vm4 = vcmp.eq.s32.totalorder %v740_v39, 1  ;;  %vm751_vm5 = vcmp.eq.s32.totalorder %v750_v40, 1  ;;  %v770_v48 = vrot.slane %v766_v42, %v729_v34  ;;  %v1363_v61 = vld [vmem:[%s2217_s3 + $0x58] sm:$0xff]  ;;  %v1366_v3 = vld [vmem:[%s2217_s3 + $0x70] sm:$0xff] }
 0x17e   : > { %1641 = vmatprep.subr.bf16.mxu1 %v1844_v26  ;;  %1653 = vmatprep.subr.bf16.mxu0 %v1844_v26  ;;  %v474_v8 = vsel %vm458_vm9, %v444_v0, %v466_v6  ;;  %v780_v49 = vrot.slane %v776_v45, %v729_v34  ;;  %v1364_v0 = vld [vmem:[%s2217_s3 + $0x60] sm:$0xff]  ;;  %v2109_v6 = vld [vmem:[%s2218_s4 + $0x10] sm:$0xff] }
 0x17f   : > { %v1642_v9 = vpack.c.bf16 %v475_v7, %v474_v8  ;;  %vm771_vm7 = vcmp.eq.s32.totalorder %v770_v48, 1 }
 0x180   : > { %vm781_vm8 = vcmp.eq.s32.totalorder %v780_v49, 1 }
 0x181   : > { %1643 = vmatpush3.bf16.msra.mxu1 %v1642_v9  ;;  %1655 = vmatpush3.bf16.msra.mxu0 %v1642_v9 }
 0x182   : > { %1656 = vmatprep.subr.bf16.mxu1 %v1844_v26 }
 0x184   : > { %1505 = vmatmul.mubr.msk.f32.vlgmr.msra.gmra.mrb[0].mxu1 %vm481_vm10, %v480_v10  ;;  %1524 = vmatmul.mubr.msk.f32.vlgmr.msra.gmra.mrb[8].mxu0 %vm481_vm10, %v1988_v12 }
 0x185   : > { %1658 = vmatpush3.bf16.msra.mxu1 %v1633_v47  ;;  %1542 = vmatprep.mubr.msk.f32.mxu1 %vm1845_vm1, %v1846_v27  ;;  %v760_v47 = vrot.slane %v756_v41, %v729_v34 }
 0x186   : > { %1659 = vmatprep.subr.bf16.mxu1 %v1844_v26  ;;  %1555 = vmatprep.mubr.msk.f32.mxu0 %vm322_vm0, %v1352_v4 }
 0x187   : > { %vm761_vm6 = vcmp.eq.s32.totalorder %v760_v47, 1 }
 0x189   : > { %1661 = vmatpush3.bf16.msra.mxu1 %v1636_v56 }
 0x18a   : > { %1662 = vmatprep.subr.bf16.mxu1 %v1844_v26 }
 0x18d   : > { %1664 = vmatpush3.bf16.msra.mxu1 %v1639_v5  ;;  %v1381_v5 = vld [vmem:[%s2219_s5 + $0x8] sm:$0xff] }
 0x18e   : > { %1665 = vmatprep.subr.bf16.mxu1 %v1844_v26 }
 0x191   : > { %1667 = vmatpush3.bf16.msra.mxu1 %v1642_v9 }
 0x192   : > { %1676 = vmatprep.subr.bf16.mxu1 %v1844_v26 }
 0x194   : > { %1543 = vmatmul.mubr.msk.f32.vlgmr.msra.gmra.mrb[2].mxu1 %vm481_vm10, %v477_v11 }
 0x195   : > { %1583 = vmatprep.mubr.msk.f32.mxu1 %vm1845_vm1, %v1846_v27 }
 0x257   : > { %v550_v12 = vpop.f32.mrb[0].mxu1  ;;  %v624_v13 = vpop.f32.mrb[8].mxu0 }
 0x258   : > { %v1506_v14 = vpop.f32.mrb[1].mxu1  ;;  %554 = vrot.lane.b32.xlu1 %v550_v12, %s1838_s16  ;;  %v1525_v16 = vpop.f32.mrb[9].mxu0 }
 0x259   : > { %v1354_v14 = vld [vmem:[%s2216_s2 + $0x50] sm:$0xff]  ;;  %v1356_v16 = vld [vmem:[%s2216_s2 + $0x60] sm:$0xff] }
 0x25c   : > { %717 = vrot.lane.b32.xlu1 %v713_v15, %s1839_s17  ;;  %v1355_v15 = vld [vmem:[%s2216_s2 + $0x58] sm:$0xff] }
 0x267   : > { %v697_v17 = vpop.f32.mrb[2].mxu1 }
 0x268   : > { %701 = vrot.lane.b32.xlu0 %v697_v17, %s1840_s18  ;;  %v1544_v18 = vpop.f32.mrb[3].mxu1  ;;  %v1357_v17 = vld [vmem:[%s2216_s2 + $0x68] sm:$0xff] }
 0x269   : > { %v1358_v18 = vld [vmem:[%s2216_s2 + $0x70] sm:$0xff] }
 0x2ca   : > { %v555_v20 = vpop.permute.xlu1 %554 }
 0x2cb   : > { %v625_v21 = vadd.f32 %v624_v13, %v555_v20  ;;  %v1353_v13 = vld [vmem:[%s2216_s2 + $0x48] sm:$0xff] }
 0x2ce   : > { %v718_v29 = vpop.permute.xlu1 %717 }
 0x2da   : > { %v702_v22 = vpop.permute.xlu0 %701 }
 0x2db   : > { %v703_v23 = vadd.f32 %v702_v22, %v625_v21 }
 0x2dd   : > { %v710_v24 = vadd.f32 %v708_v19, %v703_v23  ;;  %v1359_v19 = vld [vmem:[%s2216_s2 + $0x78] sm:$0xff] }
 0x2df   : > { %1768 = vtanh.f32 %v710_v24 }
 0x2e9   : > { %v1769_v25 = vpop.eup %1768 }
 0x2ea   : > { %v719_v28 = vmul.f32 1.442695, %v1769_v25 }
 0x2ec   : > { %1770 = vpow2.f32 %v719_v28 }
 0x2f6   : > { %v1771_v30 = vpop.eup %1770 }
 0x2f7   : > { %v2053_v1 = vmul.f32 %v1771_v30, %v718_v29 }
 0x2f9   : > { %734 = vrot.lane.b32.xlu1 %v2053_v1, %s1847_s10  ;;  %724 = vrot.lane.b32.xlu0 %v2053_v1, %s1848_s11 }
 0x2fd   : > { %754 = vrot.lane.b32.xlu1 %v2053_v1, %s1849_s12  ;;  %744 = vrot.lane.b32.xlu0 %v2053_v1, %s1850_s13 }
 0x301   : > { %774 = vrot.lane.b32.xlu1 %v2053_v1, %s1851_s15  ;;  %764 = vrot.lane.b32.xlu0 %v2053_v1, %s1852_s20  ;;  %s1263_s15 = scalar_lea.sflag [#allocation4], %s240_s9 }
 0x36b   : > { %v735_v43 = vpop.permute.xlu1 %734  ;;  %v725_v44 = vpop.permute.xlu0 %724 }
 0x36c   : > { %v732_v46 = vsel %vm731_vm3, %v725_v44, %v2053_v1 }
 0x36d   : > { %v742_v51 = vsel %vm741_vm4, %v735_v43, %v732_v46 }
 0x36f   : > { %v755_v50 = vpop.permute.xlu1 %754  ;;  %v745_v52 = vpop.permute.xlu0 %744 }
 0x370   : > { %v752_v53 = vsel %vm751_vm5, %v745_v52, %v742_v51 }
 0x371   : > { %v762_v55 = vsel %vm761_vm6, %v755_v50, %v752_v53 }
 0x373   : > { %v775_v54 = vpop.permute.xlu1 %774  ;;  %v765_v56 = vpop.permute.xlu0 %764 }
 0x374   : > { %v772_v57 = vsel %vm771_vm7, %v765_v56, %v762_v55 }
 0x375   : > { %v782_v58 = vsel %vm781_vm8, %v775_v54, %v772_v57 }
 0x376   : > { %787 = vrot.lane.b32.xlu1 %v782_v58, %s1840_s18  ;;  %784 = vrot.lane.b32.xlu0 %v782_v58, %s1838_s16 }
 0x37a   : > { %793 = vrot.lane.b32.xlu1 %v782_v58, %s1841_s19  ;;  %790 = vrot.lane.b32.xlu0 %v782_v58, %s1839_s17 }
 0x37e   : > { %826 = vperm.xlu1 %1767, %v1361_v59   ;;  %821 = vperm.xlu0 %1766, %v1360_v60  }
 0x382   : > { %836 = vperm.xlu1 %1767, %v1363_v61   ;;  %831 = vperm.xlu0 %1766, %v1362_v62  }
 0x386   : > { %846 = vperm.xlu1 %1767, %v1365_v63   ;;  %841 = vperm.xlu0 %1766, %v1364_v0  }
 0x38a   : > { %856 = vperm.xlu1 %1767, %v1367_v2   ;;  %851 = vperm.xlu0 %1766, %v1366_v3   ;;  %v1377_v3 = vld [vmem:[%s2218_s4 + $0x18] sm:$0xff] }
 0x38e   : > { %1244 = vperm.xlu1 %1767, %v1381_v5   ;;  %1016 = vrot.lane.b32.xlu0 %v2109_v6, %s1843_s14  ;;  %s1339_s14 = sshll.u32 %s240_s9, 3 }
 0x38f   : > { %s242_s10 = scalar_lea.vmem [#allocation3], %s1339_s14 }
 0x3e8   : > { %v785_v7 = vpop.permute.xlu0 %784  ;;  %v788_v9 = vpop.permute.xlu1 %787 }
 0x3e9   : > { %v1668_v8 = vpack.c.bf16 %v785_v7, %v782_v58 }
 0x3eb   : > { %1669 = vmatprep.subr.bf16.mxu0 %v1668_v8 }
 0x3ec   : > { %1671 = vmatpush3.bf16.msra.mxu0 %v1668_v8  ;;  %v791_v10 = vpop.permute.xlu0 %790  ;;  %v794_v12 = vpop.permute.xlu1 %793 }
 0x3ed   : > { %v1672_v11 = vpack.c.bf16 %v791_v10, %v788_v9 }
 0x3ef   : > { %1673 = vmatprep.subr.bf16.mxu0 %v1672_v11 }
 0x3f0   : > { %1675 = vmatpush3.bf16.msra.mxu0 %v1672_v11 }
 0x3f1   : > { %1553 = vmatprep.subr.mxu0 %v794_v12 }
 0x3f4   : > { %1554 = vmatpush3.msra.mxu0 %v794_v12 }
 0x3f5   : > { %1556 = vmatmul.mubr.msk.f32.vlgmr.msra.gmra.mrb[10].mxu0 %vm322_vm0, %v1353_v13  ;;  %1688 = vmatprep.subr.bf16.mxu0 %v1844_v26 }
 0x3f6   : > { %1558 = vmatprep.mubr.msk.f32.mxu0 %vm322_vm0, %v1354_v14 }
 0x3f9   : > { %1559 = vmatmul.mubr.msk.f32.gmra.mrb[12].mxu0 %vm322_vm0, %v1355_v15 }
 0x3fa   : > { %1561 = vmatprep.mubr.msk.f32.mxu0 %vm322_vm0, %v1356_v16 }
 0x3fd   : > { %1562 = vmatmul.mubr.msk.f32.gmra.mrb[14].mxu0 %vm322_vm0, %v1357_v17  ;;  %v827_v20 = vpop.permute.xlu1 %826  ;;  %v822_v21 = vpop.permute.xlu0 %821 }
 0x3fe   : > { %1564 = vmatprep.mubr.msk.f32.mxu0 %vm322_vm0, %v1358_v18 }
 0x401   : > { %1565 = vmatmul.mubr.msk.f32.gmra.mrb[16].mxu0 %vm322_vm0, %v1359_v19  ;;  %v837_v22 = vpop.permute.xlu1 %836  ;;  %v832_v24 = vpop.permute.xlu0 %831 }
 0x402   : > { %1602 = vmatprep.mubr.msk.f32.mxu0 %vm1845_vm1, %v1846_v27 }
 0x405   : > { %v847_v36 = vpop.permute.xlu1 %846  ;;  %v842_v39 = vpop.permute.xlu0 %841 }
 0x409   : > { %v857_v51 = vpop.permute.xlu1 %856  ;;  %v852_v54 = vpop.permute.xlu0 %851 }
 0x40d   : > { %v1017_v2 = vpop.permute.xlu0 %1016 }
 0x4c8   : > { %v1557_v23 = vpop.f32.mrb[10].mxu0 }
 0x4c9   : > { %v955_v25 = vadd.f32 %v1557_v23, %v827_v20  ;;  %v949_v28 = vpop.f32.mrb[11].mxu0 }
 0x4ca   : > { %v950_v29 = vadd.f32 %v949_v28, %v822_v21 }
 0x4cb   : > { %vm989_vm9 = vcmp.gt.f32.partialorder %v955_v25, 0.0  ;;  %v997_v30 = vmul.f32 0.01, %v955_v25 }
 0x4cc   : > { %vm988_vm11 = vcmp.gt.f32.partialorder %v950_v29, 0.0  ;;  %v996_v31 = vmul.f32 0.01, %v950_v29  ;;  %v1560_v32 = vpop.f32.mrb[12].mxu0 }
 0x4cd   : > { %v1005_v33 = vsel %vm989_vm9, %v955_v25, %v997_v30  ;;  %v965_v34 = vadd.f32 %v1560_v32, %v837_v22  ;;  %v959_v35 = vpop.f32.mrb[13].mxu0 }
 0x4ce   : > { %v1004_v37 = vsel %vm988_vm11, %v950_v29, %v996_v31  ;;  %v960_v38 = vadd.f32 %v959_v35, %v832_v24 }
 0x4cf   : > { %v1677_v40 = vpack.c.bf16 %v1005_v33, %v1004_v37  ;;  %vm991_vm0 = vcmp.gt.f32.partialorder %v965_v34, 0.0  ;;  %v999_v41 = vmul.f32 0.01, %v965_v34 }
 0x4d0   : > { %vm990_vm12 = vcmp.gt.f32.partialorder %v960_v38, 0.0  ;;  %v998_v42 = vmul.f32 0.01, %v960_v38  ;;  %v1563_v43 = vpop.f32.mrb[14].mxu0 }
 0x4d1   : > { %v1007_v44 = vsel %vm991_vm0, %v965_v34, %v999_v41  ;;  %v975_v45 = vadd.f32 %v1563_v43, %v847_v36  ;;  %v969_v46 = vpop.f32.mrb[15].mxu0  ;;  %1678 = vmatpush3.bf16.msra.mxu1 %v1677_v40  ;;  %1690 = vmatpush3.bf16.msra.mxu0 %v1677_v40 }
 0x4d2   : > { %v1006_v47 = vsel %vm990_vm12, %v960_v38, %v998_v42  ;;  %v970_v48 = vadd.f32 %v969_v46, %v842_v39  ;;  %1679 = vmatprep.subr.bf16.mxu1 %v1844_v26  ;;  %1691 = vmatprep.subr.bf16.mxu0 %v1844_v26 }
 0x4d3   : > { %v1680_v49 = vpack.c.bf16 %v1007_v44, %v1006_v47  ;;  %vm993_vm13 = vcmp.gt.f32.partialorder %v975_v45, 0.0  ;;  %v1001_v50 = vmul.f32 0.01, %v975_v45 }
 0x4d4   : > { %vm992_vm14 = vcmp.gt.f32.partialorder %v970_v48, 0.0  ;;  %v1000_v52 = vmul.f32 0.01, %v970_v48  ;;  %v1566_v53 = vpop.f32.mrb[16].mxu0 }
 0x4d5   : > { %v1009_v55 = vsel %vm993_vm13, %v975_v45, %v1001_v50  ;;  %v985_v56 = vadd.f32 %v1566_v53, %v857_v51  ;;  %v979_v4 = vpop.f32.mrb[17].mxu0  ;;  %1681 = vmatpush3.bf16.msra.mxu1 %v1680_v49  ;;  %1693 = vmatpush3.bf16.msra.mxu0 %v1680_v49 }
 0x4d6   : > { %v1008_v57 = vsel %vm992_vm14, %v970_v48, %v1000_v52  ;;  %v980_v58 = vadd.f32 %v979_v4, %v852_v54  ;;  %1682 = vmatprep.subr.bf16.mxu1 %v1844_v26  ;;  %1694 = vmatprep.subr.bf16.mxu0 %v1844_v26 }
 0x4d7   : > { %v1683_v59 = vpack.c.bf16 %v1009_v55, %v1008_v57  ;;  %vm995_vm15 = vcmp.gt.f32.partialorder %v985_v56, 0.0  ;;  %v1003_v60 = vmul.f32 0.01, %v985_v56 }
 0x4d8   : > { %vm994_vm2 = vcmp.gt.f32.partialorder %v980_v58, 0.0  ;;  %v1002_v61 = vmul.f32 0.01, %v980_v58 }
 0x4d9   : > { %v1011_v62 = vsel %vm995_vm15, %v985_v56, %v1003_v60  ;;  %1684 = vmatpush3.bf16.msra.mxu1 %v1683_v59  ;;  %1696 = vmatpush3.bf16.msra.mxu0 %v1683_v59 }
 0x4da   : > { %v1010_v63 = vsel %vm994_vm2, %v980_v58, %v1002_v61  ;;  %1685 = vmatprep.subr.bf16.mxu1 %v1844_v26  ;;  %1697 = vmatprep.subr.bf16.mxu0 %v1844_v26 }
 0x4db   : > { %v1686_v0 = vpack.c.bf16 %v1011_v62, %v1010_v63 }
 0x4dd   : > { %1687 = vmatpush3.bf16.msra.mxu1 %v1686_v0  ;;  %1699 = vmatpush3.bf16.msra.mxu0 %v1686_v0 }
 0x4de   : > { %1700 = vmatprep.subr.bf16.mxu1 %v1844_v26 }
 0x4e0   : > { %1584 = vmatmul.mubr.msk.f32.vlgmr.msra.gmra.mrb[4].mxu1 %vm481_vm10, %v1017_v2  ;;  %1603 = vmatmul.mubr.msk.f32.vlgmr.msra.gmra.mrb[18].mxu0 %vm481_vm10, %v2109_v6 }
 0x4e1   : > { %1702 = vmatpush3.bf16.msra.mxu1 %v1677_v40  ;;  %1621 = vmatprep.mubr.msk.f32.mxu1 %vm1845_vm1, %v1846_v27  ;;  %vm715_vm1 = vcmask 1043456  }
 0x4e2   : > { %1703 = vmatprep.subr.bf16.mxu1 %v1844_v26 }
 0x4e5   : > { %1705 = vmatpush3.bf16.msra.mxu1 %v1680_v49 }
 0x4e6   : > { %1706 = vmatprep.subr.bf16.mxu1 %v1844_v26 }
 0x4e9   : > { %1708 = vmatpush3.bf16.msra.mxu1 %v1683_v59 }
 0x4ea   : > { %1709 = vmatprep.subr.bf16.mxu1 %v1844_v26  ;;  %v1245_v26 = vpop.permute.xlu1 %1244 }
 0x4ed   : > { %1711 = vmatpush3.bf16.msra.mxu1 %v1686_v0 }
 0x4f0   : > { %1622 = vmatmul.mubr.msk.f32.vlgmr.msra.gmra.mrb[6].mxu1 %vm481_vm10, %v1377_v3 }
 0x5b3   : > { %v1086_v5 = vpop.f32.mrb[4].mxu1  ;;  %v1160_v6 = vpop.f32.mrb[18].mxu0 }
 0x5b4   : > { %v1585_v7 = vpop.f32.mrb[5].mxu1  ;;  %1090 = vrot.lane.b32.xlu0 %v1086_v5, %s1838_s16  ;;  %v1604_v27 = vpop.f32.mrb[19].mxu0  ;;  %s1383_s16 = sshll.u32 %s1910_s25, 7  ;;  %s1853_s25 = smov [#allocation3]  }
 0x5b5   : > { %s2172_s13 = scalar_lea.hbm %s2220_s6, %s1383_s16  ;;  %s1778_s26 = sshll.u32 %s1853_s25, 4  ;;  %s1779_s26 = int_to_ptr.vmem [resolvable:$false] %s1778_s26 }
 0x5b6   : > { %s1780_s28 = scalar_lea.vmem %s1779_s26, 256 }
 0x5c3   : > { %v1233_v8 = vpop.f32.mrb[6].mxu1 }
 0x5c4   : > { %1237 = vrot.lane.b32.xlu1 %v1233_v8, %s1840_s18  ;;  %v1623_v9 = vpop.f32.mrb[7].mxu1  ;;  %s1276_s18 = sshll.u32 %s242_s10, 4  ;;  %s2174_s18 = int_to_ptr.vmem [resolvable:$true] %s1276_s18 }
 0x5c5   : > { %s1774_s20 = scalar_lea.vmem %s2174_s18, 128  ;;  %p1781_p0 = scmp.lt.s32.totalorder %s2174_s18, %s1779_s26 }
 0x5c6   : > { %p1775_p11 = scmp.ne.s32.totalorder %s2174_s18, %s1774_s20  ;;  %p1782_p1 = scmp.lt.s32.totalorder %s1780_s28, %s1774_s20 }
 0x5c8   : > { %p1776_p12 = pnand %p1775_p11, %p1927_p5  ;;  %p1783_p2 = por %p1782_p1, %p1781_p0 }
 0x5ca   : > { %p1777_p13 = pneg %p1776_p12 }
 0x5cc   : > { %p1784_p3 = pnand %p1783_p2, %p1777_p13 }
 0x626   : > { %v1091_v10 = vpop.permute.xlu0 %1090 }
 0x627   : > { %v1161_v11 = vadd.f32 %v1160_v6, %v1091_v10 }
 0x636   : > { %v1238_v12 = vpop.permute.xlu1 %1237 }
 0x637   : > { %v1239_v13 = vadd.f32 %v1238_v12, %v1161_v11 }
 0x639   : > { %v1247_v14 = vadd.f32 %v1245_v26, %v1239_v13 }
 0x63b   : > { %1772 = vtanh.f32 %v1247_v14 }
 0x645   : > { %v1773_v15 = vpop.eup %1772 }
 0x646   : > { %v1250_v16 = vrot.slane %v1773_v15, 4 }
 0x648   : > { %v1252_v17 = vadd.f32 %v1250_v16, %v2053_v1  ;;  %v1253_v18 = vsub.f32 %v2053_v1, %v1250_v16 }
 0x64a   : > { %v1255_v19 = vrot.slane %v1252_v17, 4  ;;  %v1258_v20 = vrot.slane %v1253_v18, 4 }
 0x64c   : > { %v1260_v21 = vsel %vm715_vm1, %v1255_v19, %v1258_v20 }
 0x64d   : > { %1261 = vst [vmem:[%s242_s10] sm:$0xff] %v1260_v21 }
 0x64e   : > { %1787 = shalt.err (!%p1784_p3)
}
 0x64f   : > { %s1788_s17 = scalar_lea.hbm %s2172_s13, 128  ;;  %s1792_s9 = scalar_lea.hbm %s2220_s6, 256 }
 0x650   : > { %p1789_p4 = scmp.ne.s32.totalorder %s2172_s13, %s1788_s17  ;;  %p1793_p9 = scmp.lt.u32.totalorder %s2172_s13, %s2220_s6 }
 0x651   : > { %p1794_p10 = scmp.lt.u32.totalorder %s1792_s9, %s1788_s17  ;;  %p1796_p12 = scmp.lt.u32.totalorder %s1788_s17, %s2172_s13 }
 0x652   : > { %p1790_p7 = pnand %p1789_p4, %p1927_p5 }
 0x653   : > { %p1795_p11 = por %p1794_p10, %p1793_p9 }
 0x654   : > { %p1791_p8 = pneg %p1790_p7 }
 0x655   : > { %p1797_p13 = por %p1796_p12, %p1795_p11 }
 0x657   : > { %p1798_p0 = pnand %p1797_p13, %p1791_p8 }
 0x659   : > { %1801 = shalt.err (!%p1798_p0)
}
 0x65a   : > { %1712 = dma.vmem_to_hbm [thread:$0]  (%p1927_p5), %s2174_s18, 128, %s2172_s13, %s1263_s15  }
 0x65b PF: > { %p1718_p1 = scmp.ge.s32.totalorder %s1836_s24, 2  ;;  %s1288_s10 = sand.u32 1, %s1824_s21  }
 0x65c   : > { %s1289_s11 = scalar_lea.sflag [#allocation4], %s1288_s10 }
 0x65d   : > { %p1715_p2 = pnand %p1718_p1, %p1931_p6 }
 0x65f   : > { %1819 = dma.done.wait (!%p1715_p2), %s1289_s11, 128  }
 0x660   : > { %1821 = vsyncadd (!%p1715_p2), %s1289_s11, 4294967168  ;;  %p16_p3 = scmp.ge.s32.totalorder %s1914_s27, 4   ;;  %s2223_s21 = smov %s1828_s22 }
 0x661   : > { %s2224_s22 = smov %s1832_s23  ;;  %s2225_s23 = smov %s1925_s30 }
 0x662   : > { %s2226_s24 = smov %s1914_s27  ;;  %18 = sbr.rel (!%p16_p3) target bundleno = 3 (0x3), region = 83 }
 0x669   :  { %1294 = vsyncpa [#allocation4], 1 }
 0x66a   :  { %1296 = vsyncpa [#allocation4 + $0x1], 1 }

</bundles_post_ra>
